<compile_context>
chip_gen: v7x
topology: tpu7x:2x2x1
jax: 0.10.0
libtpu: 0.0.40
codegen_flags: <defaults>
</compile_context>

<pallas_src>
import jax
import jax.numpy as jnp
from jax.experimental import pallas as pl
from jax.experimental.pallas import tpu as pltpu


def _kernel(w_ref, b_ref, x_ref, o_ref):
    # w_ref: (3, 3) f32 in SMEM  (BN folded into conv weights)
    # b_ref: (3,)   f32 in SMEM  (BN folded into conv bias)
    # x_ref: (1, 3, TR, L) VMEM input block (one sample, all 3 channels)
    # o_ref: (1, TR, L)    VMEM output block
    x = x_ref[0]                      # (3, TR, L)
    x0, x1, x2 = x[0], x[1], x[2]     # per-channel (TR, L) slabs
    acc = None
    for c in range(3):                # unrolled over the 3 conv output channels
        y = (w_ref[c, 0] * x0 + w_ref[c, 1] * x1 + w_ref[c, 2] * x2) + b_ref[c]
        y = jnp.maximum(y, 0.0)       # ReLU
        # split(x, 1, dim=1) -> (y, z, w); y+z+w == sum over channel axis
        acc = y if acc is None else acc + y
    o_ref[0] = acc


def _pick_row_tile(rows, target=2048):
    """Largest multiple of 8 that divides `rows` and is <= target; else full dim."""
    cap = min(rows, target)
    start = cap - (cap % 8)
    for cand in range(start, 0, -8):
        if rows % cand == 0:
            return cand
    return rows   # full second-to-last dim is always a legal block size


def node_with_multiple_outputs_forward(inp, conv_w, conv_b,
                                       bn_gamma, bn_beta, bn_mean, bn_var,
                                       eps=1e-5):
    """inp: (N, 3, H, W) float32 NCHW. Returns (N, 1, H, W) float32."""
    N, C, H, W = inp.shape
    assert C == 3
    HW = H * W

    # Free (layout-preserving) view of the NCHW tensor: lanes = last 128 pixels.
    if HW % 128 == 0:
        L = 128
        R = HW // 128
    else:
        L = HW
        R = 1
    x_view = inp.reshape(N, C, R, L)

    # Fold conv bias + eval-mode BatchNorm into the 1x1-conv weights.
    inv_std = 1.0 / jnp.sqrt(bn_var + eps)               # (3,)
    scale = bn_gamma * inv_std                           # (3,)
    w_f = (scale[:, None] * conv_w.reshape(C, C)).astype(jnp.float32)   # (3,3)
    b_f = (scale * conv_b + bn_beta - bn_mean * scale).astype(jnp.float32)  # (3,)

    TR = _pick_row_tile(R)
    grid = (N, R // TR)

    out_mat = pl.pallas_call(
        _kernel,
        out_shape=jax.ShapeDtypeStruct((N, R, L), jnp.float32),
        grid_spec=pltpu.PrefetchScalarGridSpec(
            num_scalar_prefetch=0,
            grid=grid,
            in_specs=[
                pl.BlockSpec(memory_space=pltpu.MemorySpace.SMEM),   # folded weights
                pl.BlockSpec(memory_space=pltpu.MemorySpace.SMEM),   # folded bias
                pl.BlockSpec((1, C, TR, L), lambda n, r: (n, 0, r, 0)),
            ],
            out_specs=pl.BlockSpec((1, TR, L), lambda n, r: (n, r, 0)),
        ),
        compiler_params=pltpu.CompilerParams(
            dimension_semantics=("parallel", "parallel"),
            vmem_limit_bytes=32 * 1024 * 1024,
        ),
    )(w_f, b_f, x_view)

    # Free view back to NCHW with a single output channel.
    return out_mat.reshape(N, 1, H, W)


if __name__ == "__main__":
    key = jax.random.PRNGKey(0)
    k_inp, k_w, k_b = jax.random.split(key, 3)

    N, C, H, W = 2, 3, 16, 16
    inp = jax.random.normal(k_inp, (N, C, H, W), dtype=jnp.float32)

    # Deterministic parameter init (shapes from Conv2d(3,3,(1,1)) / BatchNorm2d(3)).
    conv_w = jax.random.normal(k_w, (C, C, 1, 1), dtype=jnp.float32) * 0.1
    conv_b = jax.random.normal(k_b, (C,), dtype=jnp.float32) * 0.1
    bn_gamma = jnp.ones((C,), jnp.float32)
    bn_beta = jnp.zeros((C,), jnp.float32)
    bn_mean = jnp.zeros((C,), jnp.float32)
    bn_var = jnp.ones((C,), jnp.float32)

    out = node_with_multiple_outputs_forward(
        inp, conv_w, conv_b, bn_gamma, bn_beta, bn_mean, bn_var)
    out = jax.block_until_ready(out)

    # Pure-JAX reference for sanity checking.
    eps = 1e-5
    x = jnp.einsum("oi,nihw->nohw", conv_w.reshape(C, C), inp) \
        + conv_b[None, :, None, None]
    x = (x - bn_mean[None, :, None, None]) / jnp.sqrt(bn_var[None, :, None, None] + eps)
    x = x * bn_gamma[None, :, None, None] + bn_beta[None, :, None, None]
    x = jnp.maximum(x, 0.0)
    ref = x[:, 0:1] + x[:, 1:2] + x[:, 2:3]

    assert out.shape == (N, 1, H, W)
    assert jnp.allclose(out, ref, atol=1e-5, rtol=1e-5), "mismatch vs reference"
    print("KERNEL_OK")
</pallas_src>

<mosaic_0001>
module attributes {stable_mosaic.version = 11 : i64} {
  func.func @_kernel(%arg0: i32, %arg1: i32, %arg2: memref<3x3xf32, #tpu.memory_space<smem>>, %arg3: memref<3xf32, #tpu.memory_space<smem>>, %arg4: memref<1x3x2x128xf32, #tpu.memory_space<vmem>>, %arg5: memref<1x2x128xf32, #tpu.memory_space<vmem>>) attributes {dimension_semantics = [#tpu.dimension_semantics<parallel>, #tpu.dimension_semantics<parallel>], iteration_bounds = array<i64: 2, 1>, scalar_prefetch = 0 : i64, scratch_operands = 0 : i64, tpu.core_type = #tpu.core_type<tc>, window_params = [{transform_indices = @transform_0, window_bounds = array<i64: 3, 3>}, {transform_indices = @transform_1, window_bounds = array<i64: 3>}, {transform_indices = @transform_2, window_bounds = array<i64: 1, 3, 2, 128>}, {transform_indices = @transform_3, window_bounds = array<i64: 1, 2, 128>}]} {
    %c0 = arith.constant 0 : index
    %c0_0 = arith.constant 0 : index
    %c0_1 = arith.constant 0 : index
    %c0_2 = arith.constant 0 : index
    %0 = vector.load %arg4[%c0, %c0_0, %c0_1, %c0_2] : memref<1x3x2x128xf32, #tpu.memory_space<vmem>>, vector<1x3x2x128xf32>
    %1 = vector.shape_cast %0 : vector<1x3x2x128xf32> to vector<3x2x128xf32>
    %2 = vector.extract_strided_slice %1 {offsets = [0, 0, 0], sizes = [1, 2, 128], strides = [1, 1, 1]} : vector<3x2x128xf32> to vector<1x2x128xf32>
    %3 = vector.shape_cast %2 : vector<1x2x128xf32> to vector<2x128xf32>
    %4 = vector.extract_strided_slice %1 {offsets = [1, 0, 0], sizes = [1, 2, 128], strides = [1, 1, 1]} : vector<3x2x128xf32> to vector<1x2x128xf32>
    %5 = vector.shape_cast %4 : vector<1x2x128xf32> to vector<2x128xf32>
    %6 = vector.extract_strided_slice %1 {offsets = [2, 0, 0], sizes = [1, 2, 128], strides = [1, 1, 1]} : vector<3x2x128xf32> to vector<1x2x128xf32>
    %7 = vector.shape_cast %6 : vector<1x2x128xf32> to vector<2x128xf32>
    %c0_3 = arith.constant 0 : index
    %c0_4 = arith.constant 0 : index
    %8 = memref.load %arg2[%c0_3, %c0_4] : memref<3x3xf32, #tpu.memory_space<smem>>
    %9 = vector.broadcast %8 : f32 to vector<2x128xf32>
    %10 = arith.mulf %9, %3 : vector<2x128xf32>
    %c0_5 = arith.constant 0 : index
    %c1 = arith.constant 1 : index
    %11 = memref.load %arg2[%c0_5, %c1] : memref<3x3xf32, #tpu.memory_space<smem>>
    %12 = vector.broadcast %11 : f32 to vector<2x128xf32>
    %13 = arith.mulf %12, %5 : vector<2x128xf32>
    %14 = arith.addf %10, %13 : vector<2x128xf32>
    %c0_6 = arith.constant 0 : index
    %c2 = arith.constant 2 : index
    %15 = memref.load %arg2[%c0_6, %c2] : memref<3x3xf32, #tpu.memory_space<smem>>
    %16 = vector.broadcast %15 : f32 to vector<2x128xf32>
    %17 = arith.mulf %16, %7 : vector<2x128xf32>
    %18 = arith.addf %14, %17 : vector<2x128xf32>
    %c0_7 = arith.constant 0 : index
    %19 = memref.load %arg3[%c0_7] : memref<3xf32, #tpu.memory_space<smem>>
    %20 = vector.broadcast %19 : f32 to vector<2x128xf32>
    %21 = arith.addf %18, %20 : vector<2x128xf32>
    %cst = arith.constant 0.000000e+00 : f32
    %22 = vector.broadcast %cst : f32 to vector<2x128xf32>
    %23 = arith.maximumf %21, %22 : vector<2x128xf32>
    %c1_8 = arith.constant 1 : index
    %c0_9 = arith.constant 0 : index
    %24 = memref.load %arg2[%c1_8, %c0_9] : memref<3x3xf32, #tpu.memory_space<smem>>
    %25 = vector.broadcast %24 : f32 to vector<2x128xf32>
    %26 = arith.mulf %25, %3 : vector<2x128xf32>
    %c1_10 = arith.constant 1 : index
    %c1_11 = arith.constant 1 : index
    %27 = memref.load %arg2[%c1_10, %c1_11] : memref<3x3xf32, #tpu.memory_space<smem>>
    %28 = vector.broadcast %27 : f32 to vector<2x128xf32>
    %29 = arith.mulf %28, %5 : vector<2x128xf32>
    %30 = arith.addf %26, %29 : vector<2x128xf32>
    %c1_12 = arith.constant 1 : index
    %c2_13 = arith.constant 2 : index
    %31 = memref.load %arg2[%c1_12, %c2_13] : memref<3x3xf32, #tpu.memory_space<smem>>
    %32 = vector.broadcast %31 : f32 to vector<2x128xf32>
    %33 = arith.mulf %32, %7 : vector<2x128xf32>
    %34 = arith.addf %30, %33 : vector<2x128xf32>
    %c1_14 = arith.constant 1 : index
    %35 = memref.load %arg3[%c1_14] : memref<3xf32, #tpu.memory_space<smem>>
    %36 = vector.broadcast %35 : f32 to vector<2x128xf32>
    %37 = arith.addf %34, %36 : vector<2x128xf32>
    %cst_15 = arith.constant 0.000000e+00 : f32
    %38 = vector.broadcast %cst_15 : f32 to vector<2x128xf32>
    %39 = arith.maximumf %37, %38 : vector<2x128xf32>
    %40 = arith.addf %23, %39 : vector<2x128xf32>
    %c2_16 = arith.constant 2 : index
    %c0_17 = arith.constant 0 : index
    %41 = memref.load %arg2[%c2_16, %c0_17] : memref<3x3xf32, #tpu.memory_space<smem>>
    %42 = vector.broadcast %41 : f32 to vector<2x128xf32>
    %43 = arith.mulf %42, %3 : vector<2x128xf32>
    %c2_18 = arith.constant 2 : index
    %c1_19 = arith.constant 1 : index
    %44 = memref.load %arg2[%c2_18, %c1_19] : memref<3x3xf32, #tpu.memory_space<smem>>
    %45 = vector.broadcast %44 : f32 to vector<2x128xf32>
    %46 = arith.mulf %45, %5 : vector<2x128xf32>
    %47 = arith.addf %43, %46 : vector<2x128xf32>
    %c2_20 = arith.constant 2 : index
    %c2_21 = arith.constant 2 : index
    %48 = memref.load %arg2[%c2_20, %c2_21] : memref<3x3xf32, #tpu.memory_space<smem>>
    %49 = vector.broadcast %48 : f32 to vector<2x128xf32>
    %50 = arith.mulf %49, %7 : vector<2x128xf32>
    %51 = arith.addf %47, %50 : vector<2x128xf32>
    %c2_22 = arith.constant 2 : index
    %52 = memref.load %arg3[%c2_22] : memref<3xf32, #tpu.memory_space<smem>>
    %53 = vector.broadcast %52 : f32 to vector<2x128xf32>
    %54 = arith.addf %51, %53 : vector<2x128xf32>
    %cst_23 = arith.constant 0.000000e+00 : f32
    %55 = vector.broadcast %cst_23 : f32 to vector<2x128xf32>
    %56 = arith.maximumf %54, %55 : vector<2x128xf32>
    %57 = arith.addf %40, %56 : vector<2x128xf32>
    %c0_24 = arith.constant 0 : index
    %c0_25 = arith.constant 0 : index
    %c0_26 = arith.constant 0 : index
    %58 = vector.load %arg5[%c0_24, %c0_25, %c0_26] : memref<1x2x128xf32, #tpu.memory_space<vmem>>, vector<1x2x128xf32>
    %59 = vector.shape_cast %58 : vector<1x2x128xf32> to vector<2x128xf32>
    %60 = vector.shape_cast %57 : vector<2x128xf32> to vector<1x2x128xf32>
    tpu.vector_store %arg5[%c0_24, %c0_25, %c0_26], %60 {strides = array<i32>} : memref<1x2x128xf32, #tpu.memory_space<vmem>>, vector<1x2x128xf32>,
    return
  }
  func.func @transform_0(%arg0: i32, %arg1: i32) -> (i32, i32) {
    %c0_i32 = arith.constant 0 : i32
    %c0_i32_0 = arith.constant 0 : i32
    %c0_i32_1 = arith.constant 0 : i32
    return %c0_i32, %c0_i32_0 : i32, i32
  }
  func.func @transform_1(%arg0: i32, %arg1: i32) -> i32 {
    %c0_i32 = arith.constant 0 : i32
    %c0_i32_0 = arith.constant 0 : i32
    return %c0_i32 : i32
  }
  func.func @transform_2(%arg0: i32, %arg1: i32) -> (i32, i32, i32, i32) {
    %c0_i32 = arith.constant 0 : i32
    %c0_i32_0 = arith.constant 0 : i32
    %c0_i32_1 = arith.constant 0 : i32
    return %arg0, %c0_i32, %arg1, %c0_i32_0 : i32, i32, i32, i32
  }
  func.func @transform_3(%arg0: i32, %arg1: i32) -> (i32, i32, i32) {
    %c0_i32 = arith.constant 0 : i32
    %c0_i32_0 = arith.constant 0 : i32
    return %arg0, %arg1, %c0_i32 : i32, i32, i32
  }
}

</mosaic_0001>

<bundles_post_ra>
// kernel: tpu_custom_call.1
= control target key start
LH: loop header
LB: loop body
LE: loop exit
PB: predicated region body
PF: predicated region fallthrough
CT: control target
= control target key end

     0   :  { %8 = vsyncpa [#allocation5], 0  ;;  %s918_s0 = inlined_call_operand.hbm [shape: f32[3,3], index: 0, kind: input, shape index: {}]   ;;  %s919_s1 = inlined_call_operand.vmem [shape: f32[3], index: 1, kind: input, shape index: {}]   ;;  %s920_s2 = inlined_call_operand.hbm [shape: f32[2,3,2,128], index: 2, kind: input, shape index: {}]   ;;  %s921_s3 = inlined_call_operand.hbm [shape: f32[2,2,128], index: 3, kind: output, shape index: {}]  }
   0x1   :  { %9 = vsyncpa [#allocation6], 0 }
   0x2   :  { %10 = vsyncpa [#allocation3], 0 }
   0x3   :  { %12 = vsyncpa [#allocation3 + $0x1], 0 }
   0x4   :  { %13 = vsyncpa [#allocation4], 0 }
   0x5   :  { %15 = vsyncpa [#allocation4 + $0x1], 0  ;;  %s691_s12 = smov 0   ;;  %s693_s13 = smov 0  }
   0x6   :  { %s695_s14 = smov 0   ;;  %s697_s15 = smov 0  }
   0x7   :  { %s699_s16 = smov 0   ;;  %s701_s17 = smov 0  }
   0x8 LB: > { %s402_s18 = sadd.s32 4294967295, %s663_s17   ;;  %s403_s19 = sadd.s32 4294967294, %s663_s17   ;;  %s663_s17 = sphi %s701_s17, %s21_s17   ;;  %s659_s16 = sphi %s699_s16, %s942_s16   ;;  %s655_s15 = sphi %s697_s15, %s941_s15   ;;  %s651_s14 = sphi %s695_s14, %s940_s14   ;;  %s647_s13 = sphi %s693_s13, %s939_s13   ;;  %s643_s12 = sphi %s691_s12, %s938_s12  }
   0x9   : > { %s84_s20 = sadd.s32 1, %s651_s14  ;;  %p91_p0 = scmp.ne.s32.totalorder %s651_s14, %s647_s13 }
   0xa   : > { %p92_p1 = scmp.eq.s32.totalorder %s663_s17, 0  ;;  %p97_p2 = scmp.ne.s32.totalorder %s647_s13, %s643_s12 }
   0xb   : > { %p729_p3 = scmp.eq.s32.totalorder %s402_s18, 0  ;;  %p123_p4 = scmp.eq.s32.totalorder %s402_s18, 1 }
   0xc   : > { %p93_p5 = por %p92_p1, %p91_p0  ;;  %p129_p6 = scmp.eq.s32.totalorder %s403_s19, 1 }
   0xd   : > { %s926_s21 = scalar_select %p729_p3, 1, 0 }
   0xe   : > { %p735_p7 = por %p729_p3, %p97_p2  ;;  %p739_p8 = por %p123_p4, %p91_p0 }
   0xf   : > { %p743_p9 = por %p129_p6, %p97_p2  ;;  %p404_p10 = scmp.ge.s32.totalorder %s663_s17, 1 }
  0x10   : > { %s927_s22 = scalar_select %p735_p7, 1, 0 }
  0x11   : > { %s928_s23 = scalar_select %p739_p8, 1, 0 }
  0x12   : > { %s929_s24 = scalar_select %p743_p9, 1, 0 }
  0x13   : > { %p136_p11 = scmp.lt.s32.totalorder %s663_s17, 3  ;;  %p459_p1 = scmp.lt.s32.totalorder %s663_s17, 2 }
  0x14   : > { %s158_s28 = sshll.u32 %s919_s1, 4  ;;  %s169_s4 = sand.u32 1, %s651_s14   ;;  %s159_s28 = int_to_ptr.vmem [resolvable:$true] %s158_s28 }
  0x15   : > { %p750_p13 = pnand %p404_p10, %p136_p11  ;;  %p760_p4 = pnand %p459_p1, %p93_p5 }
  0x16   : > { %s33_s5 = sadd.s32 1, %s659_s16  ;;  %s515_s8 = scalar_lea.hbm %s918_s0, 64 }
  0x17   : > { %p442_p0 = pneg %p750_p13  ;;  %p516_p5 = scmp.ne.s32.totalorder %s918_s0, %s515_s8 }
  0x18   : > { %p522_p1 = scmp.lt.u32.totalorder %s515_s8, %s918_s0 }
  0x19   : > { %p766_p2 = pnand %p442_p0, %p729_p3 }
  0x1b   : > { %p517_p6 = pneg %p766_p2 }
  0x1d   : > { %p518_p10 = pnand %p517_p6, %p516_p5 }
  0x1f   : > { %p519_p11 = pneg %p518_p10 }
  0x21   : > { %p524_p0 = pnand %p522_p1, %p519_p11 }
  0x23   : > { %527 = shalt.err (!%p524_p0)
}
  0x24   : > { %s665_s19 = smov [#allocation2]   ;;  %s528_s6 = scalar_lea.vmem %s159_s28, 16 }
  0x25   : > { %445 = dma.hbm_to_smem (!%p766_p2), %s918_s0, 64, %s665_s19, [#allocation5]  }
  0x26   : > { %p529_p12 = scmp.ne.s32.totalorder %s159_s28, %s528_s6  ;;  %p536_p7 = scmp.lt.s32.totalorder %s159_s28, %s159_s28 }
  0x27   : > { %p537_p5 = scmp.lt.s32.totalorder %s528_s6, %s528_s6 }
  0x28   : > { %p531_p9 = pnand %p529_p12, %p517_p6 }
  0x29   : > { %p538_p10 = por %p537_p5, %p536_p7 }
  0x2a   : > { %p532_p8 = pneg %p531_p9 }
  0x2c   : > { %p539_p3 = pnand %p538_p10, %p532_p8 }
  0x2e   : > { %542 = shalt.err (!%p539_p3)
}
  0x2f   : > { %s666_s7 = smov [#allocation7]   ;;  %p35_p11 = scmp.ge.s32.totalorder %s33_s5, 2 }
  0x30   : > { %448 = dma.vmem_to_smem (!%p766_p2), %s159_s28, 16, %s666_s7, [#allocation6]  }
  0x31   : > { %s427_s8 = smul.u32 6, %s169_s4  ;;  %s944_s5 = smov (%p35_p11, %s33_s5), 0 }
  0x32   : > { %s428_s9 = smul.u32 96, %s659_s16  ;;  %s79_s10 = ssub.s32 %s659_s16, %s944_s5 }
  0x33   : > { %s173_s11 = scalar_lea.vmem [#allocation8], %s427_s8  ;;  %p82_p3 = scmp.eq.s32.totalorder %s79_s10, 0 }
  0x34   : > { %s181_s18 = sshll.u32 %s173_s11, 4  ;;  %s800_s26 = scalar_lea.hbm %s920_s2, %s428_s9  ;;  %s802_s18 = int_to_ptr.vmem [resolvable:$true] %s181_s18 }
  0x35   : > { %s807_s28 = scalar_select %p82_p3, %s651_s14, %s84_s20  }
  0x36   : > { %s811_s27 = scalar_lea.sflag [#allocation3], %s169_s4  ;;  %s543_s6 = scalar_lea.hbm %s800_s26, 96 }
  0x37   : > { %p544_p7 = scmp.ne.s32.totalorder %s800_s26, %s543_s6  ;;  %p545_p8 = pneg %p760_p4 }
  0x38   : > { %s548_s9 = scalar_lea.hbm %s920_s2, 192  ;;  %p549_p2 = scmp.lt.u32.totalorder %s800_s26, %s920_s2 }
  0x39   : > { %p546_p9 = pnand %p545_p8, %p544_p7  ;;  %p550_p6 = scmp.lt.u32.totalorder %s548_s9, %s543_s6 }
  0x3a   : > { %p552_p0 = scmp.lt.u32.totalorder %s543_s6, %s800_s26 }
  0x3b   : > { %p547_p12 = pneg %p546_p9  ;;  %p551_p1 = por %p550_p6, %p549_p2 }
  0x3d   : > { %p553_p5 = por %p552_p0, %p551_p1 }
  0x3f   : > { %p554_p10 = pnand %p553_p5, %p547_p12 }
  0x41   : > { %557 = shalt.err (!%p554_p10)
}
  0x42   : > { %s558_s20 = scalar_lea.vmem %s802_s18, 96  ;;  %s667_s4 = smov [#allocation8]  }
  0x43   : > { %p559_p11 = scmp.ne.s32.totalorder %s802_s18, %s558_s20  ;;  %s563_s30 = sshll.u32 %s667_s4, 4  ;;  %s564_s30 = int_to_ptr.vmem [resolvable:$false] %s563_s30 }
  0x44   : > { %s565_s19 = scalar_lea.vmem %s564_s30, 192  ;;  %p566_p9 = scmp.lt.s32.totalorder %s802_s18, %s564_s30 }
  0x45   : > { %p561_p3 = pnand %p559_p11, %p545_p8  ;;  %p567_p2 = scmp.lt.s32.totalorder %s565_s19, %s558_s20 }
  0x47   : > { %p562_p7 = pneg %p561_p3  ;;  %p568_p6 = por %p567_p2, %p566_p9 }
  0x49   : > { %p569_p1 = pnand %p568_p6, %p562_p7 }
  0x4b   : > { %572 = shalt.err (!%p569_p1)
}
  0x4c   : > { %s668_s6 = smov 32   ;;  %s669_s7 = smov 2  }
  0x4d   : > { %452 = dma.hbm_to_vmem [thread:$0]  (!%p760_p4), %s800_s26, 96, %s802_s18, %s811_s27, %s668_s6, %s668_s6, %s669_s7  }
  0x4e   : > { %193 = sbr.rel (%p750_p13) target bundleno = 133 (0x85), region = 32  ;;  %p933_p8 = scmp.ne.s32.totalorder (!%p750_p13), %s926_s21, 0 }
  0x55   : > { %626 = dma.done.wait (%p933_p8), [#allocation5], 64  }
  0x56   : > { %628 = vsyncadd (%p933_p8), [#allocation5], 4294967232 }
  0x57   : > { %630 = dma.done.wait (%p933_p8), [#allocation6], 16  }
  0x58   : > { %632 = vsyncadd (%p933_p8), [#allocation6], 4294967280  ;;  %s850_s8 = sand.u32 1, %s647_s13   ;;  %p934_p13 = scmp.ne.s32.totalorder %s927_s22, 0 }
  0x59   : > { %s429_s25 = smul.u32 6, %s850_s8  ;;  %s204_s29 = scalar_lea.sflag [#allocation3], %s850_s8 }
  0x5b   : > { %s207_s18 = scalar_lea.vmem [#allocation8], %s429_s25 }
  0x5c   : > { %634 = dma.done.wait (%p934_p13), %s204_s29, 96  }
  0x5d   : > { %636 = vsyncadd (%p934_p13), %s204_s29, 4294967200 }
  0x5e   : > { %212 = sfence }
  0x5f   : > { %s234_s26 = sld [smem:[#allocation2]]  ;;  %s413_s27 = sld [smem:[#allocation2 + $0x1]]  ;;  %v231_v0 = vld [vmem:[%s207_s18] sm:$0x3]  ;;  %v232_v1 = vld [vmem:[%s207_s18 + $0x2] sm:$0x3] }
  0x60   : > { %s414_s9 = sld [smem:[#allocation2 + $0x2]]  ;;  %s858_s21 = sld [smem:[#allocation7]]  ;;  %v233_v2 = vld [vmem:[%s207_s18 + $0x4] sm:$0x3] }
  0x61   : > { %s415_s10 = sld [smem:[#allocation2 + $0x80]]  ;;  %s416_s11 = sld [smem:[#allocation2 + $0x81]] }
  0x62   : > { %s417_s20 = sld [smem:[#allocation2 + $0x82]]  ;;  %s860_s4 = sld [smem:[#allocation7 + $0x1]] }
  0x63   : > { %s419_s30 = sld [smem:[#allocation2 + $0x100]]  ;;  %s420_s19 = sld [smem:[#allocation2 + $0x101]] }
  0x64   : > { %s421_s6 = sld [smem:[#allocation2 + $0x102]]  ;;  %s412_s7 = sshll.u32 %s850_s8, 1 }
  0x65   : > { %v235_v3 = vstv %s234_s26  ;;  %v238_v5 = vstv %s413_s27  ;;  %s422_s22 = sld [smem:[#allocation7 + $0x2]]  ;;  %s230_s25 = scalar_lea.vmem [#allocation9], %s412_s7 }
  0x66   : > { %v236_v4 = vmul.f32 %v235_v3, %v231_v0  ;;  %v242_v6 = vstv %s414_s9  ;;  %v239_v7 = vmul.f32 %v238_v5, %v232_v1  ;;  %v246_v16 = vstv %s858_s21  ;;  %s297_s29 = sshll.u32 %s230_s25, 4  ;;  %s424_s18 = sshll.u32 %s655_s15, 5  ;;  %s866_s29 = int_to_ptr.vmem [resolvable:$true] %s297_s29 }
  0x67   : > { %v243_v8 = vmul.f32 %v242_v6, %v233_v2  ;;  %v250_v9 = vstv %s415_s10  ;;  %v253_v11 = vstv %s416_s11  ;;  %s871_s9 = scalar_lea.hbm %s921_s3, %s424_s18  ;;  %s283_s21 = scalar_lea.sflag [#allocation4], %s850_s8 }
  0x68   : > { %v251_v10 = vmul.f32 %v250_v9, %v231_v0  ;;  %v257_v12 = vstv %s417_s20  ;;  %v240_v13 = vadd.f32 %v239_v7, %v236_v4  ;;  %v254_v14 = vmul.f32 %v253_v11, %v232_v1  ;;  %s573_s10 = scalar_lea.vmem %s866_s29, 32  ;;  %p935_p12 = scmp.ne.s32.totalorder %s928_s23, 0 }
  0x69   : > { %v258_v15 = vmul.f32 %v257_v12, %v233_v2  ;;  %v266_v17 = vstv %s419_s30  ;;  %v269_v18 = vstv %s420_s19  ;;  %v261_v24 = vstv %s860_s4  ;;  %p574_p4 = scmp.ne.s32.totalorder %s866_s29, %s573_s10  ;;  %s670_s15 = smov [#allocation9]  }
  0x6a   : > { %v273_v19 = vstv %s421_s6  ;;  %v244_v20 = vadd.f32 %v243_v8, %v240_v13  ;;  %v255_v21 = vadd.f32 %v254_v14, %v251_v10  ;;  %v267_v22 = vmul.f32 %v266_v17, %v231_v0  ;;  %s577_s11 = sshll.u32 %s670_s15, 4  ;;  %s578_s11 = int_to_ptr.vmem [resolvable:$false] %s577_s11 }
  0x6b   : > { %v270_v23 = vmul.f32 %v269_v18, %v232_v1  ;;  %v274_v25 = vmul.f32 %v273_v19, %v233_v2  ;;  %v277_v29 = vstv %s422_s22  ;;  %p575_p0 = pnand %p574_p4, %p935_p12  ;;  %s579_s20 = scalar_lea.vmem %s578_s11, 64 }
  0x6c   : > { %v247_v26 = vadd.f32 %v246_v16, %v244_v20  ;;  %v259_v27 = vadd.f32 %v258_v15, %v255_v21  ;;  %p580_p10 = scmp.lt.s32.totalorder %s866_s29, %s578_s11  ;;  %p581_p11 = scmp.lt.s32.totalorder %s579_s20, %s573_s10 }
  0x6d   : > { %v271_v28 = vadd.f32 %v270_v23, %v267_v22  ;;  %p576_p5 = pneg %p575_p0 }
  0x6e   : > { %v248_v30 = vmax.f32 %v247_v26, 0.0  ;;  %v262_v31 = vadd.f32 %v261_v24, %v259_v27  ;;  %p582_p3 = por %p581_p11, %p580_p10 }
  0x6f   : > { %v275_v32 = vadd.f32 %v274_v25, %v271_v28 }
  0x70   : > { %v263_v33 = vmax.f32 %v262_v31, 0.0  ;;  %p583_p7 = pnand %p582_p3, %p576_p5 }
  0x71   : > { %v278_v34 = vadd.f32 %v277_v29, %v275_v32 }
  0x72   : > { %v264_v35 = vadd.f32 %v263_v33, %v248_v30 }
  0x73   : > { %v279_v36 = vmax.f32 %v278_v34, 0.0 }
  0x75   : > { %v280_v37 = vadd.f32 %v279_v36, %v264_v35 }
  0x77   : > { %281 = vst [vmem:[%s230_s25] sm:$0x3] %v280_v37 }
  0x78   : > { %586 = shalt.err (!%p583_p7)
}
  0x79   : > { %s587_s8 = scalar_lea.hbm %s871_s9, 32  ;;  %s591_s19 = scalar_lea.hbm %s921_s3, 64 }
  0x7a   : > { %p588_p9 = scmp.ne.s32.totalorder %s871_s9, %s587_s8  ;;  %p592_p1 = scmp.lt.u32.totalorder %s871_s9, %s921_s3 }
  0x7b   : > { %p593_p8 = scmp.lt.u32.totalorder %s591_s19, %s587_s8  ;;  %p595_p4 = scmp.lt.u32.totalorder %s587_s8, %s871_s9 }
  0x7c   : > { %p589_p2 = pnand %p588_p9, %p935_p12 }
  0x7d   : > { %p594_p13 = por %p593_p8, %p592_p1 }
  0x7e   : > { %p590_p6 = pneg %p589_p2 }
  0x7f   : > { %p596_p0 = por %p595_p4, %p594_p13 }
  0x81   : > { %p597_p5 = pnand %p596_p0, %p590_p6 }
  0x83   : > { %600 = shalt.err (!%p597_p5)
}
  0x84   : > { %440 = dma.vmem_to_hbm [thread:$0]  (%p935_p12), %s866_s29, 32, %s871_s9, %s283_s21  }
  0x85 PF: > { %s309_s7 = sand.u32 1, %s643_s12   ;;  %p936_p10 = scmp.ne.s32.totalorder %s929_s24, 0 }
  0x86   : > { %p937_p11 = scmp.ge.s32.totalorder %s663_s17, 2  ;;  %s310_s25 = scalar_lea.sflag [#allocation4], %s309_s7 }
  0x88   : > { %p454_p3 = pnand %p937_p11, %p936_p10 }
  0x8a   : > { %638 = dma.done.wait (!%p454_p3), %s310_s25, 32  }
  0x8b   : > { %640 = vsyncadd (!%p454_p3), %s310_s25, 4294967264  ;;  %s21_s17 = sadd.s32 1, %s663_s17   ;;  %s938_s12 = smov %s647_s13 }
  0x8c   : > { %p18_p7 = scmp.ge.s32.totalorder %s21_s17, 4   ;;  %s939_s13 = smov %s651_s14 }
  0x8d   : > { %s940_s14 = smov %s807_s28  ;;  %s941_s15 = smov %s659_s16 }
  0x8e   : > { %s942_s16 = smov %s944_s5  ;;  %20 = sbr.rel (!%p18_p7) target bundleno = 8 (0x8), region = 87 }
  0x95   :  { %315 = vsyncpa [#allocation3], 1 }
  0x96   :  { %317 = vsyncpa [#allocation3 + $0x1], 1 }
  0x97   :  { %318 = vsyncpa [#allocation4], 1 }
  0x98   :  { %320 = vsyncpa [#allocation4 + $0x1], 1 }
  0x99   :  { %321 = vsyncpa [#allocation5], 1 }
  0x9a   :  { %323 = vsyncpa [#allocation5 + $0x1], 1 }
  0x9b   :  { %324 = vsyncpa [#allocation6], 1 }
  0x9c   :  { %326 = vsyncpa [#allocation6 + $0x1], 1 }

</bundles_post_ra>
